<compile_context>
chip_gen: v5e
topology: v5e:2x2
jax: 0.10.0
libtpu: 0.0.40
codegen_flags: <defaults>
</compile_context>

<pallas_src>
import jax
import jax.numpy as jnp
from jax.experimental import pallas as pl
from jax.experimental.pallas import tpu as pltpu

BN_EPS = 1e-5


# ---------------------------------------------------------------------------
# Kernels
# ---------------------------------------------------------------------------
def _lane_max(x_ref):
    """(1, C, L) block ref -> (C, 1) f32 max over the lane axis.

    Elementwise VPU maxima over 128-lane strips (when cheap to unroll) so only
    one XLU lane-reduce remains at the end.
    """
    _, _, L = x_ref.shape
    if L % 128 == 0 and 2 <= (L // 128) <= 32:
        part = x_ref[0, :, 0:128].astype(jnp.float32)
        for k in range(1, L // 128):
            part = jnp.maximum(part,
                               x_ref[0, :, k * 128:(k + 1) * 128].astype(jnp.float32))
        return jnp.max(part, axis=1, keepdims=True)
    return jnp.max(x_ref[0].astype(jnp.float32), axis=1, keepdims=True)


def _fused_kernel(x_ref, w1, b1, w2, b2, w3, b3, w4, b4, out_ref):
    """Fused pass: max-pool + folded-BN 1x1-conv MLP + broadcast multiply.

    x/out blocks: (1, C, L).  x is read from HBM exactly once.
    """
    h = _lane_max(x_ref)                                       # (C, 1) f32
    for w, b in ((w1, b1), (w2, b2), (w3, b3), (w4, b4)):
        # (Cout, Cin) @ (Cin, 1): tiny -- noise vs the HBM-bound slab traffic.
        h = jnp.maximum(
            jnp.dot(w[...], h, preferred_element_type=jnp.float32) + b[...], 0.0)
    out_ref[0] = (x_ref[0].astype(jnp.float32) * h).astype(out_ref.dtype)


def _pool_kernel(x_ref, pool_ref, acc_sc):
    """Two-pass fallback, pass 1: tiled global max-pool.

    grid = (split, N, n_l); x block (1, C, TL); pool block (1, 1, C, 1);
    acc_sc VMEM (C, AW).  Last grid axis is the reduction; the leading `split`
    axis yields per-core partial maxima (megacore-friendly at small N).
    """
    l = pl.program_id(2)

    @pl.when(l == 0)
    def _():
        acc_sc[...] = jnp.full(acc_sc.shape, -jnp.inf, acc_sc.dtype)

    _, _, TL = x_ref.shape
    aw = acc_sc.shape[1]
    if aw > 1 and TL % aw == 0:
        # VPU running max over 128-lane strips; pipelines under the DMA.
        part = x_ref[0, :, 0:aw].astype(jnp.float32)
        for k in range(1, TL // aw):
            part = jnp.maximum(part,
                               x_ref[0, :, k * aw:(k + 1) * aw].astype(jnp.float32))
    else:
        part = jnp.max(x_ref[0].astype(jnp.float32), axis=1, keepdims=True)
    acc_sc[...] = jnp.maximum(acc_sc[...], part)

    @pl.when(l == pl.num_programs(2) - 1)
    def _():
        pool_ref[0, 0] = jnp.max(acc_sc[...], axis=1, keepdims=True)


def _mul_kernel(x_ref, attn_ref, out_ref):
    """Two-pass fallback, pass 2: lane-dense broadcast multiply."""
    out_ref[0] = (x_ref[0].astype(jnp.float32) * attn_ref[0]).astype(out_ref.dtype)


# ---------------------------------------------------------------------------
# Tiling / VMEM budgeting helpers
# ---------------------------------------------------------------------------
def _vmem_limit_bytes():
    cap = 64 * 1024 * 1024                       # conservative default (v7x physical)
    try:
        info = pltpu.get_tpu_info()
        cap = int(getattr(info, "vmem_capacity_bytes", cap))
    except Exception:
        pass
    # 3/4 of physical, capped: ~48 MiB on v7x, ~96 MiB on v5e/v6e.
    return max(16 * 1024 * 1024, min(3 * cap // 4, 96 * 1024 * 1024))


def _choose_div_tile(C, Lp, budget_bytes, itemsize):
    """Largest lane tile (multiple of 128 dividing Lp, or Lp itself) fitting budget."""
    if C * Lp * itemsize <= budget_bytes:
        return Lp
    max_tl = max(128, (budget_bytes // (itemsize * C)) // 128 * 128)
    for t in range(min(max_tl, Lp), 127, -128):
        if Lp % t == 0:
            return t
    return 128


# ---------------------------------------------------------------------------
# Wrapper
# ---------------------------------------------------------------------------
def channel_attention_pallas(x_nchw, params, *, spatial_tile=None,
                             max_fused_bytes=None, donate_x=False):
    """x_nchw: (N, C, H, W) float32/bfloat16.
    params: 4 tuples of (w (Cin,Cout), b, gamma, beta, mean, var)."""
    N, C, H, W = x_nchw.shape
    L = H * W
    dtype = x_nchw.dtype
    itemsize = jnp.dtype(dtype).itemsize
    x_ncl = x_nchw.reshape(N, C, L)              # free reshape, no HBM transpose

    # Fold eval-mode BatchNorm into the 1x1 convs (exact per-channel affine).
    col_params = []   # (wT (Cout, Cin), b (Cout, 1))  -- kernel (fused path)
    row_params = []   # (w  (Cin, Cout), b (Cout,))    -- JAX MLP (two-pass path)
    for (w, b, gamma, beta, mean, var) in params:
        scale = gamma / jnp.sqrt(var + BN_EPS)                 # (Cout,)
        w_f = w * scale[None, :]                               # (Cin, Cout)
        b_f = (b - mean) * scale + beta                        # (Cout,)
        col_params.append((w_f.T, b_f.reshape(-1, 1)))
        row_params.append((w_f, b_f))

    vmem_limit = _vmem_limit_bytes()
    usable = vmem_limit - 2 * 1024 * 1024        # headroom for attn/semaphores/etc.
    w_bytes = sum(int(wT.size + bc.size) * 4 for wT, bc in col_params)
    # Fused: x + out, each double-buffered (4x slab) + double-buffered weights.
    fused_budget = max(0, usable - 2 * w_bytes) // 4
    if max_fused_bytes is not None:
        fused_budget = max_fused_bytes
    pool_budget = usable // 2                    # pass 1: only the input tile (2x)
    mul_budget = usable // 4                     # pass 2: in + out (4x)

    slab_bytes = C * L * itemsize

    # ---------------- fused single-pass path ----------------
    if spatial_tile is None and slab_bytes <= fused_budget:
        w_args, w_specs = [], []
        for wT, bc in col_params:
            w_args += [wT, bc]
            w_specs += [pl.BlockSpec(wT.shape, lambda n: (0, 0)),
                        pl.BlockSpec(bc.shape, lambda n: (0, 0))]
        out_ncl = pl.pallas_call(
            _fused_kernel,
            out_shape=jax.ShapeDtypeStruct((N, C, L), dtype),
            grid_spec=pltpu.PrefetchScalarGridSpec(
                num_scalar_prefetch=0,
                grid=(N,),
                in_specs=[pl.BlockSpec((1, C, L), lambda n: (n, 0, 0))] + w_specs,
                out_specs=pl.BlockSpec((1, C, L), lambda n: (n, 0, 0)),
            ),
            compiler_params=pltpu.CompilerParams(
                dimension_semantics=("parallel",),
                vmem_limit_bytes=vmem_limit),
            input_output_aliases=({0: 0} if donate_x else {}),
        )(x_ncl, *w_args)
        return out_ncl.reshape(N, C, H, W)

    # ---------------- two-pass fallback (large L) ----------------
    if spatial_tile is not None:
        assert spatial_tile % 128 == 0, "spatial_tile must be a multiple of 128"
        TL1 = TL2 = spatial_tile
        Lp = (-(-L // spatial_tile)) * spatial_tile
    else:
        Lp = L if L % 128 == 0 else (-(-L // 128)) * 128
        TL1 = _choose_div_tile(C, Lp, pool_budget, itemsize)
        TL2 = _choose_div_tile(C, Lp, mul_budget, itemsize)
    needs_pad = (Lp != L)

    if needs_pad:
        # Max-neutral padding; padded output lanes are sliced away after the multiply.
        pad_val = float(jnp.finfo(dtype).min)
        x_in = jnp.pad(x_ncl, ((0, 0), (0, 0), (0, Lp - L)), constant_values=pad_val)
    else:
        x_in = x_ncl

    # Pass 1: tiled max-pool with an L-split leading parallel axis (megacore).
    n_l1 = Lp // TL1
    split = 2 if (n_l1 % 2 == 0 and n_l1 >= 2) else 1
    nls = n_l1 // split
    aw = 128 if (TL1 % 128 == 0 and TL1 // 128 <= 32) else 1

    pool_part = pl.pallas_call(
        _pool_kernel,
        out_shape=jax.ShapeDtypeStruct((split, N, C, 1), jnp.float32),
        grid_spec=pltpu.PrefetchScalarGridSpec(
            num_scalar_prefetch=0,
            grid=(split, N, nls),
            in_specs=[pl.BlockSpec((1, C, TL1),
                                   lambda s, n, l: (n, 0, s * nls + l))],
            out_specs=pl.BlockSpec((1, 1, C, 1), lambda s, n, l: (s, n, 0, 0)),
            scratch_shapes=[pltpu.VMEM((C, aw), jnp.float32)],
        ),
        compiler_params=pltpu.CompilerParams(
            dimension_semantics=("parallel", "parallel", "arbitrary"),
            vmem_limit_bytes=vmem_limit),
    )(x_in)

    # Tiny MLP hoisted to plain JAX (no 1-lane MXU matmuls, no extra pass-1 inputs).
    pooled = jnp.max(pool_part, axis=0)[:, :, 0]               # (N, C) f32
    h = pooled
    for w_f, b_f in row_params:
        h = jnp.maximum(h @ w_f + b_f, 0.0)
    attn = h[:, :, None].astype(jnp.float32)                   # (N, C, 1)

    # Pass 2: fully parallel lane-dense broadcast multiply.
    n_l2 = Lp // TL2
    alias = {0: 0} if (donate_x or needs_pad) else {}
    out_pad = pl.pallas_call(
        _mul_kernel,
        out_shape=jax.ShapeDtypeStruct((N, C, Lp), dtype),
        grid_spec=pltpu.PrefetchScalarGridSpec(
            num_scalar_prefetch=0,
            grid=(N, n_l2),
            in_specs=[pl.BlockSpec((1, C, TL2), lambda n, l: (n, 0, l)),
                      pl.BlockSpec((1, C, 1), lambda n, l: (n, 0, 0))],
            out_specs=pl.BlockSpec((1, C, TL2), lambda n, l: (n, 0, l)),
        ),
        compiler_params=pltpu.CompilerParams(
            dimension_semantics=("parallel", "parallel"),
            vmem_limit_bytes=vmem_limit),
        input_output_aliases=alias,
    )(x_in, attn)

    out_ncl = out_pad[:, :, :L] if needs_pad else out_pad
    return out_ncl.reshape(N, C, H, W)


# ---------------------------------------------------------------------------
# Pure-JAX reference & parameter init
# ---------------------------------------------------------------------------
def channel_attention_reference(x, params):
    """Mirrors the PyTorch forward (eval-mode BN)."""
    pooled = jnp.max(x, axis=(2, 3))                           # (N, C)
    h = pooled
    for (w, b, gamma, beta, mean, var) in params:
        h = h @ w + b                                          # 1x1 conv on (N,C,1,1)
        h = gamma * (h - mean) / jnp.sqrt(var + BN_EPS) + beta  # BatchNorm2d (eval)
        h = jnp.maximum(h, 0.0)                                # ReLU
    return x * h[:, :, None, None]


def make_params(in_channel, key):
    """Channel sizes: C -> C/4 -> C/16 -> C/4 -> C."""
    assert in_channel >= 16, "ChannelAttentionModule needs in_channel >= 16 (C//16 layer)"
    dims = [in_channel, in_channel // 4, in_channel // 16, in_channel // 4, in_channel]
    params = []
    for i in range(4):
        cin, cout = dims[i], dims[i + 1]
        key, k_w, k_b, k_g, k_bt, k_m, k_v = jax.random.split(key, 7)
        w = 0.2 * jax.random.normal(k_w, (cin, cout), jnp.float32)
        b = 0.1 * jax.random.normal(k_b, (cout,), jnp.float32)
        gamma = 1.0 + 0.1 * jax.random.normal(k_g, (cout,), jnp.float32)
        beta = 0.1 * jax.random.normal(k_bt, (cout,), jnp.float32)
        mean = 0.05 * jax.random.normal(k_m, (cout,), jnp.float32)
        var = 1.0 + 0.1 * jax.random.uniform(k_v, (cout,), jnp.float32)
        params.append((w, b, gamma, beta, mean, var))
    return params


if __name__ == "__main__":
    key = jax.random.PRNGKey(0)
    k_x, k_x2, k_p = jax.random.split(key, 3)

    N, C, H, W = 2, 64, 16, 16            # C divisible by 16; L = 256
    x = jax.random.normal(k_x, (N, C, H, W), jnp.float32)
    params = make_params(C, k_p)
    ref = channel_attention_reference(x, params)

    # 1) Default: fused single-pass (x read from HBM once).
    out = jax.block_until_ready(channel_attention_pallas(x, params))
    assert out.shape == ref.shape == (N, C, H, W)
    assert jnp.allclose(out, ref, rtol=1e-4, atol=1e-5), (
        float(jnp.max(jnp.abs(out - ref))))

    # 2) Forced two-pass tiled path (multi-tile accumulator + megacore L-split).
    out_tiled = jax.block_until_ready(
        channel_attention_pallas(x, params, spatial_tile=128))
    assert jnp.allclose(out_tiled, ref, rtol=1e-4, atol=1e-5), (
        float(jnp.max(jnp.abs(out_tiled - ref))))

    # 3) Two-pass with L not a multiple of 128 (exercises the padding fallback).
    x2 = jax.random.normal(k_x2, (N, C, 10, 10), jnp.float32)
    ref2 = channel_attention_reference(x2, params)
    out2 = jax.block_until_ready(
        channel_attention_pallas(x2, params, max_fused_bytes=0))
    assert jnp.allclose(out2, ref2, rtol=1e-4, atol=1e-5), (
        float(jnp.max(jnp.abs(out2 - ref2))))

    # 4) bf16 I/O path (compute stays f32 in-register).
    x_bf = x.astype(jnp.bfloat16)
    ref_bf = channel_attention_reference(x_bf.astype(jnp.float32), params)
    out_bf = jax.block_until_ready(channel_attention_pallas(x_bf, params))
    assert out_bf.dtype == jnp.bfloat16
    assert jnp.allclose(out_bf.astype(jnp.float32), ref_bf, rtol=5e-2, atol=5e-2)

    # 5) Donated-x fused path (output may alias x's HBM buffer).  Run last.
    out_d = jax.block_until_ready(channel_attention_pallas(x, params, donate_x=True))
    assert jnp.allclose(out_d, ref, rtol=1e-4, atol=1e-5)

    print("KERNEL_OK")
</pallas_src>

<mosaic_0001>
module attributes {stable_mosaic.version = 11 : i64} {
  func.func @_fused_kernel(%arg0: i32, %arg1: memref<1x64x256xf32, #tpu.memory_space<vmem>>, %arg2: memref<16x64xf32, #tpu.memory_space<vmem>>, %arg3: memref<16x1xf32, #tpu.memory_space<vmem>>, %arg4: memref<4x16xf32, #tpu.memory_space<vmem>>, %arg5: memref<4x1xf32, #tpu.memory_space<vmem>>, %arg6: memref<16x4xf32, #tpu.memory_space<vmem>>, %arg7: memref<16x1xf32, #tpu.memory_space<vmem>>, %arg8: memref<64x16xf32, #tpu.memory_space<vmem>>, %arg9: memref<64x1xf32, #tpu.memory_space<vmem>>, %arg10: memref<1x64x256xf32, #tpu.memory_space<vmem>>) attributes {dimension_semantics = [#tpu.dimension_semantics<parallel>], iteration_bounds = array<i64: 2>, scalar_prefetch = 0 : i64, scratch_operands = 0 : i64, tpu.core_type = #tpu.core_type<tc>, window_params = [{transform_indices = @transform_0, window_bounds = array<i64: 1, 64, 256>}, {pipeline_mode = #tpu.pipeline_mode<synchronous>, transform_indices = @transform_1, window_bounds = array<i64: 16, 64>}, {pipeline_mode = #tpu.pipeline_mode<synchronous>, transform_indices = @transform_2, window_bounds = array<i64: 16, 1>}, {pipeline_mode = #tpu.pipeline_mode<synchronous>, transform_indices = @transform_3, window_bounds = array<i64: 4, 16>}, {pipeline_mode = #tpu.pipeline_mode<synchronous>, transform_indices = @transform_4, window_bounds = array<i64: 4, 1>}, {pipeline_mode = #tpu.pipeline_mode<synchronous>, transform_indices = @transform_5, window_bounds = array<i64: 16, 4>}, {pipeline_mode = #tpu.pipeline_mode<synchronous>, transform_indices = @transform_6, window_bounds = array<i64: 16, 1>}, {pipeline_mode = #tpu.pipeline_mode<synchronous>, transform_indices = @transform_7, window_bounds = array<i64: 64, 16>}, {pipeline_mode = #tpu.pipeline_mode<synchronous>, transform_indices = @transform_8, window_bounds = array<i64: 64, 1>}, {transform_indices = @transform_9, window_bounds = array<i64: 1, 64, 256>}]} {
    %c0 = arith.constant 0 : index
    %c0_0 = arith.constant 0 : index
    %c0_1 = arith.constant 0 : index
    %0 = vector.load %arg1[%c0, %c0_0, %c0_1] : memref<1x64x256xf32, #tpu.memory_space<vmem>>, vector<1x64x128xf32>
    %1 = vector.shape_cast %0 : vector<1x64x128xf32> to vector<64x128xf32>
    %c0_2 = arith.constant 0 : index
    %c0_3 = arith.constant 0 : index
    %c128 = arith.constant 128 : index
    %2 = vector.load %arg1[%c0_2, %c0_3, %c128] : memref<1x64x256xf32, #tpu.memory_space<vmem>>, vector<1x64x128xf32>
    %3 = vector.shape_cast %2 : vector<1x64x128xf32> to vector<64x128xf32>
    %4 = arith.maximumf %1, %3 : vector<64x128xf32>
    %cst = arith.constant dense<0xFF800000> : vector<64xf32>
    %5 = vector.multi_reduction <maximumf>, %4, %cst [1] : vector<64x128xf32> to vector<64xf32>
    %6 = vector.shape_cast %5 : vector<64xf32> to vector<64x1xf32>
    %c0_4 = arith.constant 0 : index
    %c0_5 = arith.constant 0 : index
    %7 = vector.load %arg2[%c0_4, %c0_5] : memref<16x64xf32, #tpu.memory_space<vmem>>, vector<16x64xf32>
    %cst_6 = arith.constant dense<0.000000e+00> : vector<16x1xf32>
    %8 = tpu.matmul %7, %6, %cst_6 {dimension_numbers = #tpu.dot_dimension_numbers<[1], [0], [0], [1], [0, 0, 1, 1], [], []>} : vector<16x64xf32>, vector<64x1xf32>, vector<16x1xf32> -> vector<16x1xf32>
    %c0_7 = arith.constant 0 : index
    %c0_8 = arith.constant 0 : index
    %9 = vector.load %arg3[%c0_7, %c0_8] : memref<16x1xf32, #tpu.memory_space<vmem>>, vector<16x1xf32>
    %10 = arith.addf %8, %9 : vector<16x1xf32>
    %cst_9 = arith.constant 0.000000e+00 : f32
    %11 = vector.broadcast %cst_9 : f32 to vector<16x1xf32>
    %12 = arith.maximumf %10, %11 : vector<16x1xf32>
    %c0_10 = arith.constant 0 : index
    %c0_11 = arith.constant 0 : index
    %13 = vector.load %arg4[%c0_10, %c0_11] : memref<4x16xf32, #tpu.memory_space<vmem>>, vector<4x16xf32>
    %cst_12 = arith.constant dense<0.000000e+00> : vector<4x1xf32>
    %14 = tpu.matmul %13, %12, %cst_12 {dimension_numbers = #tpu.dot_dimension_numbers<[1], [0], [0], [1], [0, 0, 1, 1], [], []>} : vector<4x16xf32>, vector<16x1xf32>, vector<4x1xf32> -> vector<4x1xf32>
    %c0_13 = arith.constant 0 : index
    %c0_14 = arith.constant 0 : index
    %15 = vector.load %arg5[%c0_13, %c0_14] : memref<4x1xf32, #tpu.memory_space<vmem>>, vector<4x1xf32>
    %16 = arith.addf %14, %15 : vector<4x1xf32>
    %cst_15 = arith.constant 0.000000e+00 : f32
    %17 = vector.broadcast %cst_15 : f32 to vector<4x1xf32>
    %18 = arith.maximumf %16, %17 : vector<4x1xf32>
    %c0_16 = arith.constant 0 : index
    %c0_17 = arith.constant 0 : index
    %19 = vector.load %arg6[%c0_16, %c0_17] : memref<16x4xf32, #tpu.memory_space<vmem>>, vector<16x4xf32>
    %cst_18 = arith.constant dense<0.000000e+00> : vector<16x1xf32>
    %20 = tpu.matmul %19, %18, %cst_18 {dimension_numbers = #tpu.dot_dimension_numbers<[1], [0], [0], [1], [0, 0, 1, 1], [], []>} : vector<16x4xf32>, vector<4x1xf32>, vector<16x1xf32> -> vector<16x1xf32>
    %c0_19 = arith.constant 0 : index
    %c0_20 = arith.constant 0 : index
    %21 = vector.load %arg7[%c0_19, %c0_20] : memref<16x1xf32, #tpu.memory_space<vmem>>, vector<16x1xf32>
    %22 = arith.addf %20, %21 : vector<16x1xf32>
    %cst_21 = arith.constant 0.000000e+00 : f32
    %23 = vector.broadcast %cst_21 : f32 to vector<16x1xf32>
    %24 = arith.maximumf %22, %23 : vector<16x1xf32>
    %c0_22 = arith.constant 0 : index
    %c0_23 = arith.constant 0 : index
    %25 = vector.load %arg8[%c0_22, %c0_23] : memref<64x16xf32, #tpu.memory_space<vmem>>, vector<64x16xf32>
    %cst_24 = arith.constant dense<0.000000e+00> : vector<64x1xf32>
    %26 = tpu.matmul %25, %24, %cst_24 {dimension_numbers = #tpu.dot_dimension_numbers<[1], [0], [0], [1], [0, 0, 1, 1], [], []>} : vector<64x16xf32>, vector<16x1xf32>, vector<64x1xf32> -> vector<64x1xf32>
    %c0_25 = arith.constant 0 : index
    %c0_26 = arith.constant 0 : index
    %27 = vector.load %arg9[%c0_25, %c0_26] : memref<64x1xf32, #tpu.memory_space<vmem>>, vector<64x1xf32>
    %28 = arith.addf %26, %27 : vector<64x1xf32>
    %cst_27 = arith.constant 0.000000e+00 : f32
    %29 = vector.broadcast %cst_27 : f32 to vector<64x1xf32>
    %30 = arith.maximumf %28, %29 : vector<64x1xf32>
    %c0_28 = arith.constant 0 : index
    %c0_29 = arith.constant 0 : index
    %c0_30 = arith.constant 0 : index
    %31 = vector.load %arg1[%c0_28, %c0_29, %c0_30] : memref<1x64x256xf32, #tpu.memory_space<vmem>>, vector<1x64x256xf32>
    %32 = vector.shape_cast %31 : vector<1x64x256xf32> to vector<64x256xf32>
    %33 = vector.broadcast %30 : vector<64x1xf32> to vector<64x256xf32>
    %34 = arith.mulf %32, %33 : vector<64x256xf32>
    %c0_31 = arith.constant 0 : index
    %c0_32 = arith.constant 0 : index
    %c0_33 = arith.constant 0 : index
    %35 = vector.load %arg10[%c0_31, %c0_32, %c0_33] : memref<1x64x256xf32, #tpu.memory_space<vmem>>, vector<1x64x256xf32>
    %36 = vector.shape_cast %35 : vector<1x64x256xf32> to vector<64x256xf32>
    %37 = vector.shape_cast %34 : vector<64x256xf32> to vector<1x64x256xf32>
    tpu.vector_store %arg10[%c0_31, %c0_32, %c0_33], %37 {strides = array<i32>} : memref<1x64x256xf32, #tpu.memory_space<vmem>>, vector<1x64x256xf32>,
    return
  }
  func.func @transform_0(%arg0: i32) -> (i32, i32, i32) {
    %c0_i32 = arith.constant 0 : i32
    %c0_i32_0 = arith.constant 0 : i32
    %c0_i32_1 = arith.constant 0 : i32
    return %arg0, %c0_i32, %c0_i32_0 : i32, i32, i32
  }
  func.func @transform_1(%arg0: i32) -> (i32, i32) {
    %c0_i32 = arith.constant 0 : i32
    %c0_i32_0 = arith.constant 0 : i32
    %c0_i32_1 = arith.constant 0 : i32
    return %c0_i32, %c0_i32_0 : i32, i32
  }
  func.func @transform_2(%arg0: i32) -> (i32, i32) {
    %c0_i32 = arith.constant 0 : i32
    %c0_i32_0 = arith.constant 0 : i32
    %c0_i32_1 = arith.constant 0 : i32
    return %c0_i32, %c0_i32_0 : i32, i32
  }
  func.func @transform_3(%arg0: i32) -> (i32, i32) {
    %c0_i32 = arith.constant 0 : i32
    %c0_i32_0 = arith.constant 0 : i32
    %c0_i32_1 = arith.constant 0 : i32
    return %c0_i32, %c0_i32_0 : i32, i32
  }
  func.func @transform_4(%arg0: i32) -> (i32, i32) {
    %c0_i32 = arith.constant 0 : i32
    %c0_i32_0 = arith.constant 0 : i32
    %c0_i32_1 = arith.constant 0 : i32
    return %c0_i32, %c0_i32_0 : i32, i32
  }
  func.func @transform_5(%arg0: i32) -> (i32, i32) {
    %c0_i32 = arith.constant 0 : i32
    %c0_i32_0 = arith.constant 0 : i32
    %c0_i32_1 = arith.constant 0 : i32
    return %c0_i32, %c0_i32_0 : i32, i32
  }
  func.func @transform_6(%arg0: i32) -> (i32, i32) {
    %c0_i32 = arith.constant 0 : i32
    %c0_i32_0 = arith.constant 0 : i32
    %c0_i32_1 = arith.constant 0 : i32
    return %c0_i32, %c0_i32_0 : i32, i32
  }
  func.func @transform_7(%arg0: i32) -> (i32, i32) {
    %c0_i32 = arith.constant 0 : i32
    %c0_i32_0 = arith.constant 0 : i32
    %c0_i32_1 = arith.constant 0 : i32
    return %c0_i32, %c0_i32_0 : i32, i32
  }
  func.func @transform_8(%arg0: i32) -> (i32, i32) {
    %c0_i32 = arith.constant 0 : i32
    %c0_i32_0 = arith.constant 0 : i32
    %c0_i32_1 = arith.constant 0 : i32
    return %c0_i32, %c0_i32_0 : i32, i32
  }
  func.func @transform_9(%arg0: i32) -> (i32, i32, i32) {
    %c0_i32 = arith.constant 0 : i32
    %c0_i32_0 = arith.constant 0 : i32
    %c0_i32_1 = arith.constant 0 : i32
    return %arg0, %c0_i32, %c0_i32_0 : i32, i32, i32
  }
}

</mosaic_0001>

<bundles_post_ra>
// kernel: tpu_custom_call.1
= control target key start
LH: loop header
LB: loop body
LE: loop exit
PB: predicated region body
PF: predicated region fallthrough
CT: control target
= control target key end

     0   :  { %14 = vsyncpa [#allocation3], 0  ;;  %s1294_s0 = inlined_call_operand.hbm [shape: f32[2,64,256], index: 0, kind: input, shape index: {}]   ;;  %s1295_s1 = inlined_call_operand.vmem [shape: f32[16,64], index: 1, kind: input, shape index: {}]   ;;  %s1296_s2 = inlined_call_operand.vmem [shape: f32[16,1], index: 2, kind: input, shape index: {}]   ;;  %s1297_s3 = inlined_call_operand.vmem [shape: f32[4,16], index: 3, kind: input, shape index: {}]   ;;  %s1298_s4 = inlined_call_operand.vmem [shape: f32[4,1], index: 4, kind: input, shape index: {}]   ;;  %s1299_s5 = inlined_call_operand.vmem [shape: f32[16,4], index: 5, kind: input, shape index: {}]   ;;  %s1300_s6 = inlined_call_operand.vmem [shape: f32[16,1], index: 6, kind: input, shape index: {}]   ;;  %s1301_s7 = inlined_call_operand.vmem [shape: f32[64,16], index: 7, kind: input, shape index: {}]   ;;  %s1302_s8 = inlined_call_operand.vmem [shape: f32[64,1], index: 8, kind: input, shape index: {}]   ;;  %s1303_s9 = inlined_call_operand.hbm [shape: f32[2,64,256], index: 9, kind: output, shape index: {}]  }
   0x1   :  { %16 = vsyncpa [#allocation3 + $0x1], 0 }
   0x2   :  { %17 = vsyncpa [#allocation4], 0 }
   0x3   :  { %19 = vsyncpa [#allocation4 + $0x1], 0  ;;  %s993_s30 = smov 0   ;;  %s995_s10 = smov 0  }
   0x4   :  { %s997_s11 = smov 0   ;;  %s999_s12 = smov 0  }
   0x5 LB: > { %1307 = sst [smem:[#allocation8_spill]] %s932_s11  ;;  %s1014_s13 = sadd.s32 4294967295, %s936_s12   ;;  %s936_s12 = sphi %s999_s12, %s1316_s12   ;;  %s932_s11 = sphi %s997_s11, %s1318_s11   ;;  %s928_s10 = sphi %s995_s10, %s1320_s10   ;;  %s924_s30 = sphi %s993_s30, %s1319_s30  }
   0x6   : > { %s754_s14 = sadd.s32 4294967294, %s936_s12   ;;  %s1018_s15 = sadd.s32 1, %s936_s12  }
   0x7   : > { %1308 = sst [smem:[#allocation9_spill]] %s1018_s15  ;;  %s32_s16 = sadd.s32 1, %s932_s11 }
   0x8   : > { %s29_s17 = ssub.s32 %s936_s12, %s1018_s15  ;;  %p39_p0 = scmp.ne.s32.totalorder %s932_s11, %s928_s10 }
   0x9   : > { %p30_p1 = scmp.eq.s32.totalorder %s29_s17, 0  ;;  %p40_p2 = scmp.eq.s32.totalorder %s936_s12, 0 }
   0xa   : > { %p45_p3 = scmp.ne.s32.totalorder %s928_s10, %s924_s30  ;;  %p46_p4 = scmp.eq.s32.totalorder %s1014_s13, 0 }
   0xb   : > { %s1030_s18 = scalar_select %p30_p1, %s932_s11, %s32_s16  }
   0xc   : > { %p1032_p5 = por %p40_p2, %p39_p0  ;;  %p1036_p6 = por %p46_p4, %p45_p3 }
   0xd   : > { %1309 = sst [smem:[#allocation10_spill]] %s1030_s18  ;;  %p237_p7 = scmp.eq.s32.totalorder %s1014_s13, 1 }
   0xe   : > { %p243_p8 = scmp.eq.s32.totalorder %s754_s14, 1  ;;  %p798_p10 = scmp.lt.s32.totalorder %s936_s12, 2 }
   0xf   : > { %p1043_p11 = por %p237_p7, %p39_p0  ;;  %s287_s23 = sand.u32 1, %s932_s11  }
  0x10   : > { %p1047_p12 = por %p243_p8, %p45_p3  ;;  %s782_s24 = sshll.u32 %s936_s12, 7 }
  0x11   : > { %s757_s25 = sshll.u32 %s287_s23, 7  ;;  %s296_s28 = scalar_lea.hbm %s1294_s0, %s782_s24 }
  0x12   : > { %s297_s29 = sshll.u32 %s296_s28, 4  ;;  %s291_s14 = scalar_lea.vmem [#allocation2], %s757_s25  ;;  %s298_s29 = int_to_ptr.hbm [resolvable:$true] %s297_s29 }
  0x13   : > { %s299_s16 = sshll.u32 %s291_s14, 4  ;;  %p1058_p13 = pnand %p798_p10, %p1032_p5  ;;  %s300_s16 = int_to_ptr.vmem [resolvable:$true] %s299_s16 }
  0x14   : > { %p760_p0 = scmp.ge.s32.totalorder %s936_s12, 1  ;;  %p307_p1 = scmp.lt.s32.totalorder %s936_s12, 3 }
  0x15   : > { %s288_s18 = scalar_lea.sflag [#allocation3], %s287_s23  ;;  %s840_s11 = sshra.s32 %s298_s29, 4  ;;  %s841_s11 = int_to_ptr.hbm [resolvable:$true] %s840_s11 }
  0x16   : > { %s842_s15 = scalar_lea.hbm %s841_s11, 128  ;;  %p844_p3 = pneg %p1058_p13 }
  0x17   : > { %p843_p2 = scmp.ne.s32.totalorder %s841_s11, %s842_s15  ;;  %s847_s19 = scalar_lea.hbm %s1294_s0, 256 }
  0x18   : > { %p848_p5 = scmp.lt.s32.totalorder %s841_s11, %s1294_s0  ;;  %p849_p8 = scmp.lt.s32.totalorder %s847_s19, %s842_s15 }
  0x19   : > { %p845_p4 = pnand %p844_p3, %p843_p2 }
  0x1a   : > { %p850_p10 = por %p849_p8, %p848_p5 }
  0x1b   : > { %p846_p7 = pneg %p845_p4 }
  0x1d   : > { %p851_p9 = pnand %p850_p10, %p846_p7 }
  0x1f   : > { %854 = shalt.err (!%p851_p9)
}
  0x20   : > { %s938_s23 = smov 256   ;;  %s939_s28 = smov 16  }
  0x21   : > { %793 = dma.hbm_to_vmem [thread:$0]  (!%p1058_p13), %s298_s29, 2048, %s300_s16, %s288_s18, %s938_s23, %s938_s23, %s939_s28  }
  0x22   : > { %p308_p2 = pnand %p760_p0, %p307_p1 }
  0x23   : > { %s1079_s14 = sand.u32 (!%p308_p2), 1, %s928_s10  }
  0x24   : > { %311 = sbr.rel (%p308_p2) target bundleno = 889 (0x379), region = 56  ;;  %s761_s11 = sshll.u32 (!%p308_p2), %s1079_s14, 7 }
  0x25   : > { %s314_s15 = scalar_lea.sflag (!%p308_p2), [#allocation3], %s1079_s14  ;;  %s317_s24 = scalar_lea.vmem (!%p308_p2), [#allocation2], %s761_s11 }
  0x29   : > { %915 = dma.done.wait (%p1036_p6), %s314_s15, 2048  }
  0x2a   : > { %917 = vsyncadd (%p1036_p6), %s314_s15, 4294965248  ;;  %v1089_v0 = vld [vmem:[%s317_s24 + $0x70] sm:$0xff]  ;;  %v1091_v1 = vld [vmem:[%s317_s24 + $0x78] sm:$0xff]  ;;  %vm397_vm0 = vcmask 523264   ;;  %vm431_vm1 = vcmask 130048   ;;  %vm467_vm2 = vcmask 1043456  }
  0x2b   : > { %v1093_v2 = vld [vmem:[%s317_s24 + $0x50] sm:$0xff]  ;;  %v376_v3 = vmax.f32 %v1089_v0, %v1091_v1  ;;  %v1097_v4 = vld [vmem:[%s317_s24 + $0x58] sm:$0xff]  ;;  %v1107_v9 = vld [vmem:[%s317_s24 + $0x60] sm:$0xff]  ;;  %vm460_vm3 = vcmask 31744   ;;  %s1228_s18 = scalar_lea.vmem [#allocation5], %s761_s11  ;;  %s783_s11 = sshll.u32 %s1014_s13, 7 }
  0x2c   : > { %v374_v5 = vmax.f32 %v1093_v2, %v1097_v4  ;;  %v1101_v6 = vld [vmem:[%s317_s24 + $0x30] sm:$0xff]  ;;  %v1103_v7 = vld [vmem:[%s317_s24 + $0x38] sm:$0xff]  ;;  %v1109_v10 = vld [vmem:[%s317_s24 + $0x68] sm:$0xff]  ;;  %s677_s16 = scalar_lea.hbm %s1303_s9, %s783_s11  ;;  %s678_s17 = sshll.u32 %s1228_s18, 4  ;;  %s679_s17 = int_to_ptr.vmem [resolvable:$true] %s678_s17 }
  0x2d   : > { %391 = vmax.xlane.f32.xlu0 %v376_v3  ;;  %v372_v8 = vmax.f32 %v1101_v6, %v1103_v7  ;;  %v1111_v11 = vld [vmem:[%s317_s24 + $0x40] sm:$0xff]  ;;  %v1113_v12 = vld [vmem:[%s317_s24 + $0x48] sm:$0xff]  ;;  %v375_v15 = vmax.f32 %v1107_v9, %v1109_v10  ;;  %v1125_v18 = vld [vmem:[%s317_s24 + $0x10] sm:$0xff]  ;;  %s680_s25 = sshll.u32 %s677_s16, 4  ;;  %s666_s13 = scalar_lea.sflag [#allocation4], %s1079_s14  ;;  %s681_s25 = int_to_ptr.hbm [resolvable:$true] %s680_s25 }
  0x2e   : > { %387 = vmax.xlane.f32.xlu1 %v374_v5  ;;  %v1115_v13 = vld [vmem:[%s317_s24 + $0x20] sm:$0xff]  ;;  %v1117_v14 = vld [vmem:[%s317_s24 + $0x28] sm:$0xff]  ;;  %v373_v16 = vmax.f32 %v1111_v11, %v1113_v12  ;;  %v1127_v19 = vld [vmem:[%s317_s24 + $0x18] sm:$0xff]  ;;  %v940_v5 = vmov 0   ;;  %s884_s19 = sshra.s32 %s681_s25, 4  ;;  %s890_s28 = scalar_lea.hbm %s1303_s9, 256  ;;  %s885_s19 = int_to_ptr.hbm [resolvable:$true] %s884_s19 }
  0x2f   : > { %383 = vmax.xlane.f32.xlu2 %v372_v8  ;;  %v371_v17 = vmax.f32 %v1115_v13, %v1117_v14  ;;  %v1129_v20 = vld [vmem:[%s317_s24] sm:$0xff]  ;;  %v1131_v21 = vld [vmem:[%s317_s24 + $0x8] sm:$0xff]  ;;  %v370_v22 = vmax.f32 %v1125_v18, %v1127_v19  ;;  %v498_v61 = vld [vmem:[%s1301_s7 + $0x10] sm:$0xff]  ;;  %839 = vset.pattern.permute.xlu1 %v940_v5  ;;  %s886_s26 = scalar_lea.hbm %s885_s19, 128  ;;  %p891_p0 = scmp.lt.s32.totalorder %s885_s19, %s1303_s9 }
  0x30   : > { %v369_v23 = vmax.f32 %v1129_v20, %v1131_v21  ;;  %v393_v32 = vld [vmem:[%s1295_s1] sm:$0xff]  ;;  %v394_v33 = vld [vmem:[%s1295_s1 + $0x8] sm:$0xff]  ;;  %v502_v62 = vld [vmem:[%s1301_s7 + $0x30] sm:$0xff]  ;;  %837 = vset.pattern.permute.xlu2 %v940_v5  ;;  %838 = vset.pattern.permute.xlu0 %v940_v5  ;;  %p887_p6 = scmp.ne.s32.totalorder %s885_s19, %s886_s26  ;;  %p892_p1 = scmp.lt.s32.totalorder %s890_s28, %s886_s26 }
  0x31   : > { %v395_v35 = vld [vmem:[%s1296_s2] sm:$0xff]  ;;  %v396_v36 = vld [vmem:[%s1296_s2 + $0x8] sm:$0xff]  ;;  %v499_v63 = vld [vmem:[%s1301_s7 + $0x18] sm:$0xff] }
  0x32   : > { %v429_v42 = vld [vmem:[%s1297_s3] sm:$0xf]  ;;  %v457_v48 = vld [vmem:[%s1299_s5 + $0x8] sm:$0xff]  ;;  %v503_v3 = vld [vmem:[%s1301_s7 + $0x38] sm:$0xff]  ;;  %p888_p9 = pnand %p887_p6, %p1043_p11  ;;  %p893_p3 = por %p892_p1, %p891_p0 }
  0x33   : > { %v430_v43 = vld [vmem:[%s1298_s4] sm:$0xf]  ;;  %v459_v51 = vld [vmem:[%s1300_s6 + $0x8] sm:$0xff] }
  0x34   : > { %v456_v47 = vld [vmem:[%s1299_s5] sm:$0xff]  ;;  %v497_v59 = vld [vmem:[%s1301_s7 + $0x8] sm:$0xff]  ;;  %p889_p13 = pneg %p888_p9 }
  0x35   : > { %389 = vmax.xlane.f32.xlu0 %v375_v15  ;;  %v458_v50 = vld [vmem:[%s1300_s6] sm:$0xff]  ;;  %v501_v60 = vld [vmem:[%s1301_s7 + $0x28] sm:$0xff] }
  0x36   : > { %385 = vmax.xlane.f32.xlu1 %v373_v16  ;;  %v496_v57 = vld [vmem:[%s1301_s7] sm:$0xff]  ;;  %p894_p4 = pnand %p893_p3, %p889_p13 }
  0x37   : > { %381 = vmax.xlane.f32.xlu2 %v371_v17  ;;  %v500_v58 = vld [vmem:[%s1301_s7 + $0x20] sm:$0xff] }
  0x38   : > { %v504_v8 = vld [vmem:[%s1302_s8] sm:$0xff] }
  0x3d   : > { %379 = vmax.xlane.f32.xlu0 %v370_v22  ;;  %v508_v22 = vld [vmem:[%s1302_s8 + $0x20] sm:$0xff] }
  0x3e   : > { %377 = vmax.xlane.f32.xlu1 %v369_v23 }
  0xa0   : > { %v392_v24 = vpop.xlane.xlu0 %391 }
  0xa1   : > { %412 = vmatpush.msra.mxu0 %v392_v24  ;;  %v388_v25 = vpop.xlane.xlu1 %387  ;;  %v505_v24 = vld [vmem:[%s1302_s8 + $0x8] sm:$0xff] }
  0xa2   : > { %v384_v26 = vpop.xlane.xlu2 %383 }
  0xa8   : > { %v390_v27 = vpop.xlane.xlu0 %389 }
  0xa9   : > { %413 = vmatpush.msra.mxu0 %v390_v27  ;;  %v386_v28 = vpop.xlane.xlu1 %385 }
  0xaa   : > { %v382_v29 = vpop.xlane.xlu2 %381 }
  0xab   : > { %414 = vmatpush.msra.mxu0 %v388_v25 }
  0xad   : > { %415 = vmatpush.msra.mxu0 %v386_v28 }
  0xaf   : > { %416 = vmatpush.msra.mxu0 %v384_v26 }
  0xb0   : > { %v380_v30 = vpop.xlane.xlu0 %379 }
  0xb1   : > { %417 = vmatpush.msra.mxu0 %v382_v29  ;;  %v378_v31 = vpop.xlane.xlu1 %377 }
  0xb3   : > { %418 = vmatpush.msra.mxu0 %v380_v30  ;;  %v509_v30 = vld [vmem:[%s1302_s8 + $0x28] sm:$0xff] }
  0xb5   : > { %419 = vmatpush.msra.mxu0 %v378_v31 }
  0xb6   : > { %763 = vmatmul.msk.f32.vlgmr.msra.gmra.mxu0 %vm397_vm0, %v393_v32 }
  0xbe   : > { %764 = vmatmul.msk.f32.gmra.mxu0 %vm397_vm0, %v394_v33  ;;  %v506_v33 = vld [vmem:[%s1302_s8 + $0x10] sm:$0xff] }
 0x133   : > { %v421_v34 = vpop.f32.mrf.mxu0 }
 0x134   : > { %v422_v38 = vadd.f32 %v421_v34, %v395_v35 }
 0x136   : > { %v427_v41 = vmax.f32 %v422_v38, 0.0  ;;  %v507_v38 = vld [vmem:[%s1302_s8 + $0x18] sm:$0xff] }
 0x13b   : > { %v424_v37 = vpop.f32.mrf.mxu0 }
 0x13c   : > { %v425_v39 = vadd.f32 %v424_v37, %v396_v36 }
 0x13e   : > { %v428_v40 = vmax.f32 %v425_v39, 0.0 }
 0x140   : > { %449 = vmatpush.msra.mxu2 %v428_v40 }
 0x142   : > { %450 = vmatpush.msra.mxu2 %v427_v41 }
 0x143   : > { %765 = vmatmul.msk.f32.vlgmr.msra.gmra.mxu2 %vm431_vm1, %v429_v42 }
 0x1c6   : > { %v452_v44 = vpop.f32.mrf.mxu2 }
 0x1c7   : > { %v453_v45 = vadd.f32 %v452_v44, %v430_v43  ;;  %v510_v43 = vld [vmem:[%s1302_s8 + $0x30] sm:$0xff]  ;;  %v511_v44 = vld [vmem:[%s1302_s8 + $0x38] sm:$0xff] }
 0x1c9   : > { %v455_v46 = vmax.f32 %v453_v45, 0.0 }
 0x1cb   : > { %766 = vmatpush.msk.msrb.mxu2 %vm467_vm2, %v455_v46 }
 0x1cc   : > { %767 = vmatmul.msk.f32.vlgmr.msrb.gmra.mxu2 %vm460_vm3, %v456_v47 }
 0x1d4   : > { %768 = vmatmul.msk.f32.gmra.mxu2 %vm460_vm3, %v457_v48 }
 0x24f   : > { %v488_v49 = vpop.f32.mrf.mxu2 }
 0x250   : > { %v489_v53 = vadd.f32 %v488_v49, %v458_v50 }
 0x252   : > { %v494_v56 = vmax.f32 %v489_v53, 0.0 }
 0x257   : > { %v491_v52 = vpop.f32.mrf.mxu2 }
 0x258   : > { %v492_v54 = vadd.f32 %v491_v52, %v459_v51 }
 0x25a   : > { %v495_v55 = vmax.f32 %v492_v54, 0.0 }
 0x25c   : > { %550 = vmatpush.msra.mxu1 %v495_v55  ;;  %784 = vmatpush.msra.mxu3 %v495_v55 }
 0x25e   : > { %551 = vmatpush.msra.mxu1 %v494_v56  ;;  %785 = vmatpush.msra.mxu3 %v494_v56 }
 0x25f   : > { %769 = vmatmul.msk.f32.vlgmr.msra.gmra.mxu1 %vm431_vm1, %v496_v57  ;;  %773 = vmatmul.msk.f32.vlgmr.msra.gmra.mxu3 %vm431_vm1, %v500_v58 }
 0x267   : > { %770 = vmatmul.msk.f32.gmra.mxu1 %vm431_vm1, %v497_v59  ;;  %774 = vmatmul.msk.f32.gmra.mxu3 %vm431_vm1, %v501_v60 }
 0x26f   : > { %771 = vmatmul.msk.f32.gmra.mxu1 %vm431_vm1, %v498_v61  ;;  %775 = vmatmul.msk.f32.gmra.mxu3 %vm431_vm1, %v502_v62 }
 0x277   : > { %772 = vmatmul.msk.f32.gmra.mxu1 %vm431_vm1, %v499_v63  ;;  %776 = vmatmul.msk.f32.gmra.mxu3 %vm431_vm1, %v503_v3 }
 0x2dc   : > { %v553_v15 = vpop.f32.mrf.mxu1 }
 0x2dd   : > { %v554_v16 = vadd.f32 %v553_v15, %v504_v8 }
 0x2df   : > { %v577_v17 = vmax.f32 %v554_v16, 0.0 }
 0x2e1   : > { %595 = vperm.xlu2 %837, %v577_v17  }
 0x2e2   : > { %v565_v23 = vpop.f32.mrf.mxu3 }
 0x2e3   : > { %v566_v25 = vadd.f32 %v565_v23, %v508_v22 }
 0x2e4   : > { %v556_v26 = vpop.f32.mrf.mxu1 }
 0x2e5   : > { %v557_v27 = vadd.f32 %v556_v26, %v505_v24  ;;  %v581_v28 = vmax.f32 %v566_v25, 0.0 }
 0x2e7   : > { %v578_v29 = vmax.f32 %v557_v27, 0.0 }
 0x2e9   : > { %615 = vperm.xlu2 %837, %v581_v28   ;;  %600 = vperm.xlu0 %838, %v578_v29  }
 0x2ea   : > { %v568_v31 = vpop.f32.mrf.mxu3 }
 0x2eb   : > { %v569_v32 = vadd.f32 %v568_v31, %v509_v30 }
 0x2ec   : > { %v559_v34 = vpop.f32.mrf.mxu1 }
 0x2ed   : > { %v582_v35 = vmax.f32 %v569_v32, 0.0  ;;  %v560_v36 = vadd.f32 %v559_v34, %v506_v33 }
 0x2ef   : > { %620 = vperm.xlu1 %839, %v582_v35   ;;  %v579_v39 = vmax.f32 %v560_v36, 0.0 }
 0x2f2   : > { %v571_v37 = vpop.f32.mrf.mxu3 }
 0x2f3   : > { %v572_v46 = vadd.f32 %v571_v37, %v510_v43 }
 0x2f4   : > { %v562_v40 = vpop.f32.mrf.mxu1 }
 0x2f5   : > { %v563_v41 = vadd.f32 %v562_v40, %v507_v38  ;;  %v583_v49 = vmax.f32 %v572_v46, 0.0 }
 0x2f7   : > { %v580_v42 = vmax.f32 %v563_v41, 0.0  ;;  %605 = vperm.xlu1 %839, %v579_v39  }
 0x2f9   : > { %610 = vperm.xlu2 %837, %v580_v42  }
 0x2fa   : > { %v574_v45 = vpop.f32.mrf.mxu3 }
 0x2fb   : > { %v575_v47 = vadd.f32 %v574_v45, %v511_v44 }
 0x2fd   : > { %v584_v48 = vmax.f32 %v575_v47, 0.0 }
 0x2ff   : > { %630 = vperm.xlu1 %839, %v584_v48  }
 0x301   : > { %625 = vperm.xlu2 %837, %v583_v49  }
 0x33b   : > { %v596_v50 = vpop.permute.xlu2 %595 }
 0x33c   : > { %v633_v51 = vmul.f32 %v596_v50, %v1129_v20  ;;  %v634_v52 = vmul.f32 %v596_v50, %v1131_v21 }
 0x33e   : > { %649 = vst [vmem:[%s1228_s18] sm:$0xff] %v633_v51 }
 0x33f   : > { %650 = vst [vmem:[%s1228_s18 + $0x8] sm:$0xff] %v634_v52 }
 0x343   : > { %v616_v53 = vpop.permute.xlu2 %615 }
 0x344   : > { %v641_v54 = vmul.f32 %v616_v53, %v1111_v11  ;;  %v642_v20 = vmul.f32 %v616_v53, %v1113_v12 }
 0x346   : > { %657 = vst [vmem:[%s1228_s18 + $0x40] sm:$0xff] %v641_v54 }
 0x347   : > { %658 = vst [vmem:[%s1228_s18 + $0x48] sm:$0xff] %v642_v20 }
 0x353   : > { %v611_v21 = vpop.permute.xlu2 %610 }
 0x354   : > { %v639_v55 = vmul.f32 %v611_v21, %v1101_v6  ;;  %v640_v56 = vmul.f32 %v611_v21, %v1103_v7 }
 0x356   : > { %655 = vst [vmem:[%s1228_s18 + $0x30] sm:$0xff] %v639_v55 }
 0x357   : > { %656 = vst [vmem:[%s1228_s18 + $0x38] sm:$0xff] %v640_v56 }
 0x35b   : > { %v626_v57 = vpop.permute.xlu2 %625  ;;  %v601_v58 = vpop.permute.xlu0 %600 }
 0x35c   : > { %v645_v11 = vmul.f32 %v626_v57, %v1107_v9  ;;  %v646_v12 = vmul.f32 %v626_v57, %v1109_v10  ;;  %v635_v59 = vmul.f32 %v601_v58, %v1125_v18  ;;  %v636_v60 = vmul.f32 %v601_v58, %v1127_v19 }
 0x35e   : > { %661 = vst [vmem:[%s1228_s18 + $0x60] sm:$0xff] %v645_v11 }
 0x35f   : > { %662 = vst [vmem:[%s1228_s18 + $0x68] sm:$0xff] %v646_v12 }
 0x360   : > { %651 = vst [vmem:[%s1228_s18 + $0x10] sm:$0xff] %v635_v59 }
 0x361   : > { %v621_v6 = vpop.permute.xlu1 %620  ;;  %652 = vst [vmem:[%s1228_s18 + $0x18] sm:$0xff] %v636_v60 }
 0x362   : > { %v643_v7 = vmul.f32 %v621_v6, %v1093_v2  ;;  %v644_v61 = vmul.f32 %v621_v6, %v1097_v4 }
 0x364   : > { %659 = vst [vmem:[%s1228_s18 + $0x50] sm:$0xff] %v643_v7 }
 0x365   : > { %660 = vst [vmem:[%s1228_s18 + $0x58] sm:$0xff] %v644_v61 }
 0x369   : > { %v606_v9 = vpop.permute.xlu1 %605 }
 0x36a   : > { %v637_v10 = vmul.f32 %v606_v9, %v1115_v13  ;;  %v638_v18 = vmul.f32 %v606_v9, %v1117_v14 }
 0x36c   : > { %653 = vst [vmem:[%s1228_s18 + $0x20] sm:$0xff] %v637_v10 }
 0x36d   : > { %654 = vst [vmem:[%s1228_s18 + $0x28] sm:$0xff] %v638_v18 }
 0x371   : > { %v631_v2 = vpop.permute.xlu1 %630 }
 0x372   : > { %v647_v4 = vmul.f32 %v631_v2, %v1089_v0  ;;  %v648_v19 = vmul.f32 %v631_v2, %v1091_v1 }
 0x374   : > { %663 = vst [vmem:[%s1228_s18 + $0x70] sm:$0xff] %v647_v4 }
 0x375   : > { %664 = vst [vmem:[%s1228_s18 + $0x78] sm:$0xff] %v648_v19 }
 0x376   : > { %897 = shalt.err (!%p894_p4)
}
 0x377   : > { %s941_s14 = smov 256   ;;  %s942_s18 = smov 16  }
 0x378   : > { %788 = dma.vmem_to_hbm [thread:$0]  (%p1043_p11), %s679_s17, 2048, %s681_s25, %s666_s13, %s941_s14, %s941_s14, %s942_s18  }
 0x379 PF: > { %s695_s11 = sand.u32 1, %s924_s30   ;;  %p1315_p7 = scmp.ge.s32.totalorder %s936_s12, 2 }
 0x37a   : > { %s696_s20 = scalar_lea.sflag [#allocation4], %s695_s11 }
 0x37b   : > { %p795_p5 = pnand %p1315_p7, %p1047_p12 }
 0x37d   : > { %p796_p8 = pneg %p795_p5 }
 0x37f   : > { %919 = dma.done.wait (%p796_p8), %s696_s20, 2048  }
 0x380   : > { %921 = vsyncadd (%p796_p8), %s696_s20, 4294965248  ;;  %s1316_s12 = sld [smem:[#allocation9_spill]]  ;;  %s1319_s30 = smov %s928_s10 }
 0x381   : > { %s1317_s29 = sld [smem:[#allocation8_spill]] }
 0x382   : > { %s1318_s11 = sld [smem:[#allocation10_spill]] }
 0x386   : > { %p22_p10 = scmp.ge.s32.totalorder %s1316_s12, 4  }
 0x387   : > { %s1320_s10 = smov %s1317_s29 }
 0x388   :  { %24 = sbr.rel (!%p22_p10) target bundleno = 5 (0x5), region = 101 }
 0x38d   :  { %702 = vsyncpa [#allocation3], 1 }
 0x38e   :  { %704 = vsyncpa [#allocation3 + $0x1], 1 }
 0x38f   :  { %705 = vsyncpa [#allocation4], 1 }
 0x390   :  { %707 = vsyncpa [#allocation4 + $0x1], 1 }

</bundles_post_ra>
